<compile_context>
chip_gen: v5e
topology: v5e:2x2
jax: 0.10.0
libtpu: 0.0.40
codegen_flags: <defaults>
</compile_context>

<pallas_src>
import jax
import jax.numpy as jnp
from jax.experimental import pallas as pl
from jax.experimental.pallas import tpu as pltpu

HIDDEN = 32
VOCAB = 16


def _bilstm_seq_kernel(tok_ref,    # SMEM (T,) int32 token ids (scalar prefetch, used by index_map)
                       x_ref,      # (1, 1, H)   gathered embedding row for this step
                       h0c0_ref,   # (1, 4H)     [h0_fwd | h0_rev | c0_fwd | c0_rev]
                       wx_ref,     # (H, 8H)     bf16 input->gates (both dirs, interleaved cols)
                       wh_ref,     # (2H, 8H)    bf16 block-diag hidden->gates (both dirs)
                       b_ref,      # (1, 8H)     f32 merged bias (b_ih + b_hh)
                       fcw_ref,    # (2H, H)     bf16 fc weight (transposed)
                       fcb_ref,    # (1, H)      f32 fc bias
                       out_ref,    # (1, 1, H)   per-step fc output block
                       hcn_ref,    # (1, 4H)     final [h_n | c_n] (resident, last write wins)
                       hc):        # VMEM (1, 4H) f32 scratch: recurrent (h, c) carry
    H = HIDDEN
    t = pl.program_id(0)

    @pl.when(t == 0)
    def _():
        hc[...] = h0c0_ref[...]

    x = x_ref[0].astype(jnp.bfloat16)             # (1, H)
    h = hc[:, 0:2 * H]                            # (1, 2H) f32  [h_fwd | h_rev]
    c = hc[:, 2 * H:4 * H]                        # (1, 2H) f32  [c_fwd | c_rev]

    # Fused gates for both directions; weights resident in VMEM, bf16 MXU pushes,
    # f32 accumulation.  Column layout: [i_f, i_r, f_f, f_r, g_f, g_r, o_f, o_r].
    gates = (jnp.dot(x, wx_ref[...], preferred_element_type=jnp.float32)
             + jnp.dot(h.astype(jnp.bfloat16), wh_ref[...],
                       preferred_element_type=jnp.float32)
             + b_ref[...])                        # (1, 8H) f32

    # Single tanh pass: sigmoid(z) = 0.5*tanh(0.5*z) + 0.5 for the i/f/o lanes,
    # plain tanh for the g lanes.
    lane = jax.lax.broadcasted_iota(jnp.int32, gates.shape, 1)
    is_g = jnp.logical_and(lane >= 4 * H, lane < 6 * H)
    th = jnp.tanh(jnp.where(is_g, gates, 0.5 * gates))
    acts = jnp.where(is_g, th, 0.5 * th + 0.5)    # (1, 8H)

    i_b = acts[:, 0 * H:2 * H]                    # [i_fwd | i_rev]
    f_b = acts[:, 2 * H:4 * H]                    # [f_fwd | f_rev]
    g_b = acts[:, 4 * H:6 * H]                    # [g_fwd | g_rev]
    o_b = acts[:, 6 * H:8 * H]                    # [o_fwd | o_rev]

    c_new = f_b * c + i_b * g_b                   # (1, 2H)
    h_new = o_b * jnp.tanh(c_new)                 # (1, 2H) == biLSTM output for this step

    # Carry the recurrent state for the next grid step.
    hc[:, 0:2 * H] = h_new
    hc[:, 2 * H:4 * H] = c_new

    out = (jnp.dot(h_new.astype(jnp.bfloat16), fcw_ref[...],
                   preferred_element_type=jnp.float32)
           + fcb_ref[...])                        # (1, H)

    out_ref[...] = out.reshape(1, 1, H).astype(out_ref.dtype)
    hcn_ref[:, 0:2 * H] = h_new
    hcn_ref[:, 2 * H:4 * H] = c_new


def prepare_params(p):
    """One-time packing of PyTorch-convention params into kernel layout (hoisted glue)."""
    H = HIDDEN
    f32, bf16 = jnp.float32, jnp.bfloat16
    w_ih = jnp.asarray(p["w_ih"], f32)                      # (2, 4H, H), gate order i,f,g,o
    w_hh = jnp.asarray(p["w_hh"], f32)                      # (2, 4H, H)
    bias = jnp.asarray(p["b_ih"], f32) + jnp.asarray(p["b_hh"], f32)   # (2, 4H) merged
    zeros = jnp.zeros((H, H), f32)

    wx_cols, wh_cols, b_cols = [], [], []
    for g in range(4):              # gate: i, f, g, o
        for d in range(2):          # direction: 0 fwd, 1 rev
            wx_cols.append(w_ih[d, g * H:(g + 1) * H, :].T)                 # (H, H)
            top = w_hh[0, g * H:(g + 1) * H, :].T if d == 0 else zeros
            bot = w_hh[1, g * H:(g + 1) * H, :].T if d == 1 else zeros
            wh_cols.append(jnp.concatenate([top, bot], axis=0))             # (2H, H)
            b_cols.append(bias[d, g * H:(g + 1) * H])

    wx = jnp.concatenate(wx_cols, axis=1).astype(bf16)        # (H, 8H)   bf16
    wh = jnp.concatenate(wh_cols, axis=1).astype(bf16)        # (2H, 8H)  bf16
    b = jnp.concatenate(b_cols)[None, :]                      # (1, 8H)   f32

    fcw = jnp.asarray(p["fc_w"], f32).T.astype(bf16)          # (2H, H)   bf16
    fcb = jnp.asarray(p["fc_b"], f32)[None, :]                # (1, H)    f32
    emb = jnp.asarray(p["emb"], f32).reshape(VOCAB, 1, H)     # row-gather friendly
    return {"emb": emb, "wx": wx, "wh": wh, "b": b, "fcw": fcw, "fcb": fcb}


def encoder_bilstm_run(tokens, hidden, prep):
    """Run T sequential EncoderbiLSTM.forward steps inside ONE pallas_call.

    Returns (fc_out (T,1,H), (h_n (2,1,H), c_n (2,1,H))).  T=1 matches the module.
    """
    h0, c0 = hidden                                   # each (2, 1, H), PyTorch convention
    H = HIDDEN
    tokens = jnp.clip(jnp.asarray(tokens, jnp.int32).reshape(-1), 0, VOCAB - 1)
    T = tokens.shape[0]
    h0c0 = jnp.concatenate([h0.reshape(1, 2 * H), c0.reshape(1, 2 * H)],
                           axis=1).astype(jnp.float32)        # (1, 4H)

    grid_spec = pltpu.PrefetchScalarGridSpec(
        num_scalar_prefetch=1,
        grid=(T,),
        in_specs=[
            # per-step embedding row gathered by the DMA via the prefetched token id
            pl.BlockSpec((1, 1, H), lambda t, toks: (toks[t], 0, 0)),
            # everything below has a constant index_map -> DMA'd once, VMEM-resident
            pl.BlockSpec((1, 4 * H), lambda t, toks: (0, 0)),
            pl.BlockSpec((H, 8 * H), lambda t, toks: (0, 0)),
            pl.BlockSpec((2 * H, 8 * H), lambda t, toks: (0, 0)),
            pl.BlockSpec((1, 8 * H), lambda t, toks: (0, 0)),
            pl.BlockSpec((2 * H, H), lambda t, toks: (0, 0)),
            pl.BlockSpec((1, H), lambda t, toks: (0, 0)),
        ],
        out_specs=(
            pl.BlockSpec((1, 1, H), lambda t, toks: (t, 0, 0)),   # per-step fc output
            pl.BlockSpec((1, 4 * H), lambda t, toks: (0, 0)),     # final [h_n | c_n]
        ),
        scratch_shapes=[pltpu.VMEM((1, 4 * H), jnp.float32)],     # recurrent (h, c) carry
    )

    fc_out, hcn = pl.pallas_call(
        _bilstm_seq_kernel,
        out_shape=(jax.ShapeDtypeStruct((T, 1, H), jnp.float32),
                   jax.ShapeDtypeStruct((1, 4 * H), jnp.float32)),
        grid_spec=grid_spec,
        compiler_params=pltpu.CompilerParams(dimension_semantics=("arbitrary",)),
    )(tokens, prep["emb"], h0c0, prep["wx"], prep["wh"], prep["b"],
      prep["fcw"], prep["fcb"])

    hn = hcn[:, 0:2 * H].reshape(2, 1, H)
    cn = hcn[:, 2 * H:4 * H].reshape(2, 1, H)
    return fc_out, (hn, cn)


def encoder_bilstm_forward(token_idx, hidden, prep):
    """Pallas implementation of EncoderbiLSTM.forward(input, hidden) (one token)."""
    tokens = jnp.asarray(token_idx, jnp.int32).reshape(1)
    fc_out, (hn, cn) = encoder_bilstm_run(tokens, hidden, prep)
    return fc_out.reshape(1, 1, HIDDEN), (hn, cn)


def _rb(a):
    """Round to bf16 and back to f32 (emulates bf16 MXU operands, f32 accumulation)."""
    return jnp.asarray(a, jnp.float32).astype(jnp.bfloat16).astype(jnp.float32)


def _reference_step(token_idx, hidden, p):
    """Pure-JAX reference matching torch semantics (gate order i,f,g,o), bf16-operand
    emulation to match the kernel's MXU dtype choice."""
    h0, c0 = hidden
    H = HIDDEN
    x = p["emb"][token_idx].reshape(1, H)
    hs, cs = [], []
    for d in range(2):
        gates = (_rb(x) @ _rb(p["w_ih"][d].T) + _rb(h0[d]) @ _rb(p["w_hh"][d].T)
                 + p["b_ih"][d] + p["b_hh"][d])
        i, f, g, o = jnp.split(gates, 4, axis=-1)
        i, f, o = jax.nn.sigmoid(i), jax.nn.sigmoid(f), jax.nn.sigmoid(o)
        g = jnp.tanh(g)
        c_new = f * c0[d] + i * g
        h_new = o * jnp.tanh(c_new)
        hs.append(h_new)
        cs.append(c_new)
    lstm_out = jnp.concatenate(hs, axis=-1)                      # (1, 2H)
    out = _rb(lstm_out) @ _rb(p["fc_w"].T) + p["fc_b"]
    return (out.reshape(1, 1, H),
            (jnp.stack(hs).reshape(2, 1, H), jnp.stack(cs).reshape(2, 1, H)))


if __name__ == "__main__":
    key = jax.random.PRNGKey(0)
    ks = jax.random.split(key, 10)
    H = HIDDEN
    params = {
        "emb":  jax.random.normal(ks[0], (VOCAB, H), jnp.float32) * 0.1,
        "w_ih": jax.random.normal(ks[1], (2, 4 * H, H), jnp.float32) * 0.1,  # weight_ih_l0{,_reverse}
        "w_hh": jax.random.normal(ks[2], (2, 4 * H, H), jnp.float32) * 0.1,  # weight_hh_l0{,_reverse}
        "b_ih": jax.random.normal(ks[3], (2, 4 * H), jnp.float32) * 0.1,
        "b_hh": jax.random.normal(ks[4], (2, 4 * H), jnp.float32) * 0.1,
        "fc_w": jax.random.normal(ks[5], (H, 2 * H), jnp.float32) * 0.1,
        "fc_b": jax.random.normal(ks[6], (H,), jnp.float32) * 0.1,
    }
    h0 = jax.random.normal(ks[7], (2, 1, H), jnp.float32) * 0.1
    c0 = jax.random.normal(ks[8], (2, 1, H), jnp.float32) * 0.1

    # One-time weight packing (hoisted out of the per-call path), then jit'd forwards.
    prep = jax.tree_util.tree_map(jax.block_until_ready, prepare_params(params))
    fwd = jax.jit(encoder_bilstm_forward)
    seq_fwd = jax.jit(encoder_bilstm_run)

    # --- single-token forward: exactly the module's forward(input, hidden) -----------
    token = jnp.array(3, jnp.int32)
    out, (hn, cn) = fwd(token, (h0, c0), prep)
    jax.block_until_ready((out, hn, cn))
    ref_out, (ref_hn, ref_cn) = _reference_step(token, (h0, c0), params)
    assert out.shape == (1, 1, H) and hn.shape == (2, 1, H) and cn.shape == (2, 1, H)
    assert jnp.allclose(out, ref_out, atol=1e-3), "fc output mismatch"
    assert jnp.allclose(hn, ref_hn, atol=1e-3), "h_n mismatch"
    assert jnp.allclose(cn, ref_cn, atol=1e-3), "c_n mismatch"

    # --- 8 sequential forward calls fused into one pallas_call (time grid) -----------
    T = 8
    tokens = jax.random.randint(ks[9], (T,), 0, VOCAB, dtype=jnp.int32)
    seq_out, (hn_s, cn_s) = seq_fwd(tokens, (h0, c0), prep)
    jax.block_until_ready((seq_out, hn_s, cn_s))

    hid = (h0, c0)
    ref_steps = []
    for t in range(T):
        o_t, hid = _reference_step(int(tokens[t]), hid, params)
        ref_steps.append(o_t.reshape(1, H))
    ref_seq = jnp.concatenate(ref_steps, axis=0)                   # (T, H)
    assert seq_out.shape == (T, 1, H)
    assert jnp.allclose(seq_out.reshape(T, H), ref_seq, atol=1e-3), "per-step fc mismatch"
    assert jnp.allclose(hn_s, hid[0], atol=1e-3), "final h_n mismatch"
    assert jnp.allclose(cn_s, hid[1], atol=1e-3), "final c_n mismatch"

    print("KERNEL_OK")
</pallas_src>

<mosaic_0001>
module attributes {stable_mosaic.version = 11 : i64} {
  func.func @_bilstm_seq_kernel(%arg0: i32, %arg1: memref<1xi32, #tpu.memory_space<smem>>, %arg2: memref<1x1x32xf32, #tpu.memory_space<vmem>>, %arg3: memref<1x128xf32, #tpu.memory_space<vmem>>, %arg4: memref<32x256xbf16, #tpu.memory_space<vmem>>, %arg5: memref<64x256xbf16, #tpu.memory_space<vmem>>, %arg6: memref<1x256xf32, #tpu.memory_space<vmem>>, %arg7: memref<64x32xbf16, #tpu.memory_space<vmem>>, %arg8: memref<1x32xf32, #tpu.memory_space<vmem>>, %arg9: memref<1x1x32xf32, #tpu.memory_space<vmem>>, %arg10: memref<1x128xf32, #tpu.memory_space<vmem>>, %arg11: memref<1x128xf32, #tpu.memory_space<vmem>>) attributes {dimension_semantics = [#tpu.dimension_semantics<arbitrary>], iteration_bounds = array<i64: 1>, scalar_prefetch = 1 : i64, scratch_operands = 1 : i64, tpu.core_type = #tpu.core_type<tc>, window_params = [{transform_indices = @transform_0, window_bounds = array<i64: 1, 1, 32>}, {pipeline_mode = #tpu.pipeline_mode<synchronous>, transform_indices = @transform_1, window_bounds = array<i64: 1, 128>}, {pipeline_mode = #tpu.pipeline_mode<synchronous>, transform_indices = @transform_2, window_bounds = array<i64: 32, 256>}, {pipeline_mode = #tpu.pipeline_mode<synchronous>, transform_indices = @transform_3, window_bounds = array<i64: 64, 256>}, {pipeline_mode = #tpu.pipeline_mode<synchronous>, transform_indices = @transform_4, window_bounds = array<i64: 1, 256>}, {pipeline_mode = #tpu.pipeline_mode<synchronous>, transform_indices = @transform_5, window_bounds = array<i64: 64, 32>}, {pipeline_mode = #tpu.pipeline_mode<synchronous>, transform_indices = @transform_6, window_bounds = array<i64: 1, 32>}, {transform_indices = @transform_7, window_bounds = array<i64: 1, 1, 32>}, {pipeline_mode = #tpu.pipeline_mode<synchronous>, transform_indices = @transform_8, window_bounds = array<i64: 1, 128>}]} {
    %c0_i32 = arith.constant 0 : i32
    %0 = arith.cmpi eq, %arg0, %c0_i32 : i32
    %1 = arith.extui %0 : i1 to i32
    %c0_i32_0 = arith.constant 0 : i32
    %2 = arith.cmpi ne, %1, %c0_i32_0 : i32
    scf.if %2 {
      %c0_32 = arith.constant 0 : index
      %c0_33 = arith.constant 0 : index
      %51 = vector.load %arg3[%c0_32, %c0_33] : memref<1x128xf32, #tpu.memory_space<vmem>>, vector<1x128xf32>
      %c0_34 = arith.constant 0 : index
      %c0_35 = arith.constant 0 : index
      %52 = vector.load %arg11[%c0_34, %c0_35] : memref<1x128xf32, #tpu.memory_space<vmem>>, vector<1x128xf32>
      tpu.vector_store %arg11[%c0_34, %c0_35], %51 {strides = array<i32>} : memref<1x128xf32, #tpu.memory_space<vmem>>, vector<1x128xf32>,
    } else {
    }
    %c0 = arith.constant 0 : index
    %c0_1 = arith.constant 0 : index
    %c0_2 = arith.constant 0 : index
    %3 = vector.load %arg2[%c0, %c0_1, %c0_2] : memref<1x1x32xf32, #tpu.memory_space<vmem>>, vector<1x1x32xf32>
    %4 = vector.shape_cast %3 : vector<1x1x32xf32> to vector<1x32xf32>
    %5 = arith.truncf %4 : vector<1x32xf32> to vector<1x32xbf16>
    %c0_3 = arith.constant 0 : index
    %c0_4 = arith.constant 0 : index
    %6 = vector.load %arg11[%c0_3, %c0_4] : memref<1x128xf32, #tpu.memory_space<vmem>>, vector<1x64xf32>
    %c0_5 = arith.constant 0 : index
    %c64 = arith.constant 64 : index
    %7 = vector.load %arg11[%c0_5, %c64] : memref<1x128xf32, #tpu.memory_space<vmem>>, vector<1x64xf32>
    %c0_6 = arith.constant 0 : index
    %c0_7 = arith.constant 0 : index
    %8 = vector.load %arg4[%c0_6, %c0_7] : memref<32x256xbf16, #tpu.memory_space<vmem>>, vector<32x256xbf16>
    %cst = arith.constant dense<0.000000e+00> : vector<1x256xf32>
    %9 = tpu.matmul %5, %8, %cst {dimension_numbers = #tpu.dot_dimension_numbers<[1], [0], [0], [1], [0, 0, 1, 1], [], []>} : vector<1x32xbf16>, vector<32x256xbf16>, vector<1x256xf32> -> vector<1x256xf32>
    %10 = arith.truncf %6 : vector<1x64xf32> to vector<1x64xbf16>
    %c0_8 = arith.constant 0 : index
    %c0_9 = arith.constant 0 : index
    %11 = vector.load %arg5[%c0_8, %c0_9] : memref<64x256xbf16, #tpu.memory_space<vmem>>, vector<64x256xbf16>
    %cst_10 = arith.constant dense<0.000000e+00> : vector<1x256xf32>
    %12 = tpu.matmul %10, %11, %cst_10 {dimension_numbers = #tpu.dot_dimension_numbers<[1], [0], [0], [1], [0, 0, 1, 1], [], []>} : vector<1x64xbf16>, vector<64x256xbf16>, vector<1x256xf32> -> vector<1x256xf32>
    %13 = arith.addf %9, %12 : vector<1x256xf32>
    %c0_11 = arith.constant 0 : index
    %c0_12 = arith.constant 0 : index
    %14 = vector.load %arg6[%c0_11, %c0_12] : memref<1x256xf32, #tpu.memory_space<vmem>>, vector<1x256xf32>
    %15 = arith.addf %13, %14 : vector<1x256xf32>
    %16 = tpu.iota {dimensions = array<i32: 1>} : vector<1x256xi32>
    %c128_i32 = arith.constant 128 : i32
    %17 = vector.broadcast %c128_i32 : i32 to vector<1x256xi32>
    %18 = arith.cmpi sge, %16, %17 : vector<1x256xi32>
    %c192_i32 = arith.constant 192 : i32
    %19 = vector.broadcast %c192_i32 : i32 to vector<1x256xi32>
    %20 = arith.cmpi slt, %16, %19 : vector<1x256xi32>
    %21 = arith.andi %18, %20 : vector<1x256xi1>
    %cst_13 = arith.constant 5.000000e-01 : f32
    %22 = vector.broadcast %cst_13 : f32 to vector<1x256xf32>
    %23 = arith.mulf %22, %15 : vector<1x256xf32>
    %24 = arith.select %21, %15, %23 : vector<1x256xi1>, vector<1x256xf32>
    %25 = math.tanh %24 : vector<1x256xf32>
    %cst_14 = arith.constant 5.000000e-01 : f32
    %26 = vector.broadcast %cst_14 : f32 to vector<1x256xf32>
    %27 = arith.mulf %26, %25 : vector<1x256xf32>
    %cst_15 = arith.constant 5.000000e-01 : f32
    %28 = vector.broadcast %cst_15 : f32 to vector<1x256xf32>
    %29 = arith.addf %27, %28 : vector<1x256xf32>
    %30 = arith.select %21, %25, %29 : vector<1x256xi1>, vector<1x256xf32>
    %31 = vector.extract_strided_slice %30 {offsets = [0, 0], sizes = [1, 64], strides = [1, 1]} : vector<1x256xf32> to vector<1x64xf32>
    %32 = vector.extract_strided_slice %30 {offsets = [0, 64], sizes = [1, 64], strides = [1, 1]} : vector<1x256xf32> to vector<1x64xf32>
    %33 = vector.extract_strided_slice %30 {offsets = [0, 128], sizes = [1, 64], strides = [1, 1]} : vector<1x256xf32> to vector<1x64xf32>
    %34 = vector.extract_strided_slice %30 {offsets = [0, 192], sizes = [1, 64], strides = [1, 1]} : vector<1x256xf32> to vector<1x64xf32>
    %35 = arith.mulf %32, %7 : vector<1x64xf32>
    %36 = arith.mulf %31, %33 : vector<1x64xf32>
    %37 = arith.addf %35, %36 : vector<1x64xf32>
    %38 = math.tanh %37 : vector<1x64xf32>
    %39 = arith.mulf %34, %38 : vector<1x64xf32>
    %c0_16 = arith.constant 0 : index
    %c0_17 = arith.constant 0 : index
    %40 = vector.load %arg11[%c0_16, %c0_17] : memref<1x128xf32, #tpu.memory_space<vmem>>, vector<1x64xf32>
    tpu.vector_store %arg11[%c0_16, %c0_17], %39 {strides = array<i32>} : memref<1x128xf32, #tpu.memory_space<vmem>>, vector<1x64xf32>,
    %c0_18 = arith.constant 0 : index
    %c64_19 = arith.constant 64 : index
    %41 = vector.load %arg11[%c0_18, %c64_19] : memref<1x128xf32, #tpu.memory_space<vmem>>, vector<1x64xf32>
    tpu.vector_store %arg11[%c0_18, %c64_19], %37 {strides = array<i32>} : memref<1x128xf32, #tpu.memory_space<vmem>>, vector<1x64xf32>,
    %42 = arith.truncf %39 : vector<1x64xf32> to vector<1x64xbf16>
    %c0_20 = arith.constant 0 : index
    %c0_21 = arith.constant 0 : index
    %43 = vector.load %arg7[%c0_20, %c0_21] : memref<64x32xbf16, #tpu.memory_space<vmem>>, vector<64x32xbf16>
    %cst_22 = arith.constant dense<0.000000e+00> : vector<1x32xf32>
    %44 = tpu.matmul %42, %43, %cst_22 {dimension_numbers = #tpu.dot_dimension_numbers<[1], [0], [0], [1], [0, 0, 1, 1], [], []>} : vector<1x64xbf16>, vector<64x32xbf16>, vector<1x32xf32> -> vector<1x32xf32>
    %c0_23 = arith.constant 0 : index
    %c0_24 = arith.constant 0 : index
    %45 = vector.load %arg8[%c0_23, %c0_24] : memref<1x32xf32, #tpu.memory_space<vmem>>, vector<1x32xf32>
    %46 = arith.addf %44, %45 : vector<1x32xf32>
    %47 = vector.shape_cast %46 : vector<1x32xf32> to vector<1x1x32xf32>
    %c0_25 = arith.constant 0 : index
    %c0_26 = arith.constant 0 : index
    %c0_27 = arith.constant 0 : index
    %48 = vector.load %arg9[%c0_25, %c0_26, %c0_27] : memref<1x1x32xf32, #tpu.memory_space<vmem>>, vector<1x1x32xf32>
    tpu.vector_store %arg9[%c0_25, %c0_26, %c0_27], %47 {strides = array<i32>} : memref<1x1x32xf32, #tpu.memory_space<vmem>>, vector<1x1x32xf32>,
    %c0_28 = arith.constant 0 : index
    %c0_29 = arith.constant 0 : index
    %49 = vector.load %arg10[%c0_28, %c0_29] : memref<1x128xf32, #tpu.memory_space<vmem>>, vector<1x64xf32>
    tpu.vector_store %arg10[%c0_28, %c0_29], %39 {strides = array<i32>} : memref<1x128xf32, #tpu.memory_space<vmem>>, vector<1x64xf32>,
    %c0_30 = arith.constant 0 : index
    %c64_31 = arith.constant 64 : index
    %50 = vector.load %arg10[%c0_30, %c64_31] : memref<1x128xf32, #tpu.memory_space<vmem>>, vector<1x64xf32>
    tpu.vector_store %arg10[%c0_30, %c64_31], %37 {strides = array<i32>} : memref<1x128xf32, #tpu.memory_space<vmem>>, vector<1x64xf32>,
    return
  }
  func.func @transform_0(%arg0: i32, %arg1: memref<1xi32, #tpu.memory_space<smem>>) -> (i32, i32, i32) {
    %0 = arith.index_cast %arg0 : i32 to index
    %1 = memref.load %arg1[%0] : memref<1xi32, #tpu.memory_space<smem>>
    %c0_i32 = arith.constant 0 : i32
    %c0_i32_0 = arith.constant 0 : i32
    %c0_i32_1 = arith.constant 0 : i32
    return %1, %c0_i32, %c0_i32_0 : i32, i32, i32
  }
  func.func @transform_1(%arg0: i32, %arg1: memref<1xi32, #tpu.memory_space<smem>>) -> (i32, i32) {
    %c0_i32 = arith.constant 0 : i32
    %c0_i32_0 = arith.constant 0 : i32
    %c0_i32_1 = arith.constant 0 : i32
    return %c0_i32, %c0_i32_0 : i32, i32
  }
  func.func @transform_2(%arg0: i32, %arg1: memref<1xi32, #tpu.memory_space<smem>>) -> (i32, i32) {
    %c0_i32 = arith.constant 0 : i32
    %c0_i32_0 = arith.constant 0 : i32
    %c0_i32_1 = arith.constant 0 : i32
    return %c0_i32, %c0_i32_0 : i32, i32
  }
  func.func @transform_3(%arg0: i32, %arg1: memref<1xi32, #tpu.memory_space<smem>>) -> (i32, i32) {
    %c0_i32 = arith.constant 0 : i32
    %c0_i32_0 = arith.constant 0 : i32
    %c0_i32_1 = arith.constant 0 : i32
    return %c0_i32, %c0_i32_0 : i32, i32
  }
  func.func @transform_4(%arg0: i32, %arg1: memref<1xi32, #tpu.memory_space<smem>>) -> (i32, i32) {
    %c0_i32 = arith.constant 0 : i32
    %c0_i32_0 = arith.constant 0 : i32
    %c0_i32_1 = arith.constant 0 : i32
    return %c0_i32, %c0_i32_0 : i32, i32
  }
  func.func @transform_5(%arg0: i32, %arg1: memref<1xi32, #tpu.memory_space<smem>>) -> (i32, i32) {
    %c0_i32 = arith.constant 0 : i32
    %c0_i32_0 = arith.constant 0 : i32
    %c0_i32_1 = arith.constant 0 : i32
    return %c0_i32, %c0_i32_0 : i32, i32
  }
  func.func @transform_6(%arg0: i32, %arg1: memref<1xi32, #tpu.memory_space<smem>>) -> (i32, i32) {
    %c0_i32 = arith.constant 0 : i32
    %c0_i32_0 = arith.constant 0 : i32
    %c0_i32_1 = arith.constant 0 : i32
    return %c0_i32, %c0_i32_0 : i32, i32
  }
  func.func @transform_7(%arg0: i32, %arg1: memref<1xi32, #tpu.memory_space<smem>>) -> (i32, i32, i32) {
    %c0_i32 = arith.constant 0 : i32
    %c0_i32_0 = arith.constant 0 : i32
    %c0_i32_1 = arith.constant 0 : i32
    return %arg0, %c0_i32, %c0_i32_0 : i32, i32, i32
  }
  func.func @transform_8(%arg0: i32, %arg1: memref<1xi32, #tpu.memory_space<smem>>) -> (i32, i32) {
    %c0_i32 = arith.constant 0 : i32
    %c0_i32_0 = arith.constant 0 : i32
    %c0_i32_1 = arith.constant 0 : i32
    return %c0_i32, %c0_i32_0 : i32, i32
  }
}

</mosaic_0001>

<bundles_post_ra>
// kernel: encoder_bilstm_forward.1
= control target key start
LH: loop header
LB: loop body
LE: loop exit
PB: predicated region body
PF: predicated region fallthrough
CT: control target
= control target key end

     0   :  { %16 = vsyncpa [#allocation6], 0  ;;  %s608_s0 = inlined_call_operand.<no memory space> [shape: s32[1], index: 0, kind: input, shape index: {}]   ;;  %s609_s1 = inlined_call_operand.vmem [shape: f32[16,1,32], index: 1, kind: input, shape index: {}]   ;;  %s610_s2 = inlined_call_operand.vmem [shape: f32[1,128], index: 2, kind: input, shape index: {}]   ;;  %s611_s3 = inlined_call_operand.vmem [shape: bf16[32,256], index: 3, kind: input, shape index: {}]   ;;  %s612_s4 = inlined_call_operand.hbm [shape: bf16[64,256], index: 4, kind: input, shape index: {}]   ;;  %s613_s5 = inlined_call_operand.vmem [shape: f32[1,256], index: 5, kind: input, shape index: {}]   ;;  %s614_s6 = inlined_call_operand.vmem [shape: bf16[64,32], index: 6, kind: input, shape index: {}]   ;;  %s615_s7 = inlined_call_operand.vmem [shape: f32[1,32], index: 7, kind: input, shape index: {}]   ;;  %s616_s8 = inlined_call_operand.hbm [shape: f32[1,1,32], index: 8, kind: output, shape index: {0}]   ;;  %s617_s9 = inlined_call_operand.vmem [shape: f32[1,128], index: 9, kind: output, shape index: {1}]  }
   0x1   :  { %17 = vsyncpa [#allocation7], 0  ;;  %s33_s11 = sshll.u32 %s612_s4, 4  ;;  %s479_s12 = smov [#allocation5]   ;;  %s34_s11 = int_to_ptr.hbm [resolvable:$true] %s33_s11 }
   0x2   :  { %s35_s13 = sshll.u32 %s479_s12, 4  ;;  %s480_s14 = smov 128   ;;  %s36_s13 = int_to_ptr.vmem [resolvable:$true] %s35_s13 }
   0x3   :  { %s481_s15 = smov 8  }
   0x4   :  { %41 = dma.hbm_to_vmem [thread:$0]  %s34_s11, 1024, %s36_s13, [#allocation6], %s480_s14, %s480_s14, %s481_s15  }
   0x5   :  { %475 = dma.done.wait [#allocation6], 1024  }
   0x6   :  { %476 = vsyncadd [#allocation6], 4294966272  ;;  %p57_p0 = scmp.lt.s32.totalorder %s608_s0, 15  ;;  %v357_v0 = vld [vmem:[#allocation5 + $0x30] sm:$0xf]  ;;  %vm174_vm0 = vcmask 261120   ;;  %v212_v41 = vlaneseq }
   0x7   :  { %v411_v1 = vld [vmem:[#allocation5 + $0x34] sm:$0xf0]  ;;  %v410_v2 = vld [vmem:[#allocation5 + $0x34] sm:$0xf]  ;;  %v359_v4 = vld [vmem:[#allocation5 + $0x38] sm:$0xf0] }
   0x8   :  { %s619_s0 = smov (!%p57_p0, %s608_s0), 15  ;;  %v358_v3 = vor.u32 %v411_v1, %v357_v0  ;;  %v375_v5 = vld [vmem:[%s611_s3 + $0x10] sm:$0xf]  ;;  %v403_v6 = vld [vmem:[%s611_s3 + $0x14] sm:$0xf0]  ;;  %v362_v7 = vor.u32 %v410_v2, %v359_v4  ;;  %vm124_vm1 = vcmask 523264  }
   0x9   :  { %v376_v8 = vor.u32 %v403_v6, %v375_v5  ;;  %v402_v9 = vld [vmem:[%s611_s3 + $0x14] sm:$0xf]  ;;  %v377_v10 = vld [vmem:[%s611_s3 + $0x18] sm:$0xf0]  ;;  %v349_v11 = vld [vmem:[#allocation5 + $0x20] sm:$0xf]  ;;  %s59_s29 = scalar_lea.vmem %s609_s1, %s619_s0 }
   0xa   :  { %132 = vmatpush.bf16.msra.mxu0 %v358_v3  ;;  %v380_v12 = vor.u32 %v402_v9, %v377_v10  ;;  %v409_v13 = vld [vmem:[#allocation5 + $0x24] sm:$0xf0]  ;;  %v408_v14 = vld [vmem:[#allocation5 + $0x24] sm:$0xf]  ;;  %v351_v15 = vld [vmem:[#allocation5 + $0x28] sm:$0xf0]  ;;  %145 = vmatpush.bf16.msra.mxu1 %v362_v7 }
   0xb   :  { %184 = vmatpush.bf16.msra.mxu2 %v376_v8  ;;  %v350_v16 = vor.u32 %v409_v13, %v349_v11  ;;  %v354_v17 = vor.u32 %v408_v14, %v351_v15  ;;  %v367_v18 = vld [vmem:[%s611_s3] sm:$0xf]  ;;  %v401_v19 = vld [vmem:[%s611_s3 + $0x4] sm:$0xf0]  ;;  %v400_v20 = vld [vmem:[%s611_s3 + $0x4] sm:$0xf] }
   0xc   :  { %197 = vmatpush.bf16.msra.mxu3 %v380_v12  ;;  %v368_v21 = vor.u32 %v401_v19, %v367_v18  ;;  %v369_v22 = vld [vmem:[%s611_s3 + $0x8] sm:$0xf0]  ;;  %v68_v23 = vld [vmem:[%s59_s29] sm:$0x1]  ;;  %v341_v24 = vld [vmem:[#allocation5 + $0x10] sm:$0xf] }
   0xd   :  { %v372_v25 = vor.u32 %v400_v20, %v369_v22  ;;  %v407_v26 = vld [vmem:[#allocation5 + $0x14] sm:$0xf0]  ;;  %v406_v27 = vld [vmem:[#allocation5 + $0x14] sm:$0xf]  ;;  %v343_v28 = vld [vmem:[#allocation5 + $0x18] sm:$0xf0]  ;;  %v69_v29 = vpack.c.bf16 %v68_v23, %v68_v23 }
   0xe   :  { %133 = vmatpush.bf16.msra.mxu0 %v350_v16  ;;  %v342_v30 = vor.u32 %v407_v26, %v341_v24  ;;  %146 = vmatpush.bf16.msra.mxu1 %v354_v17  ;;  %v346_v31 = vor.u32 %v406_v27, %v343_v28  ;;  %v333_v32 = vld [vmem:[#allocation5] sm:$0xf]  ;;  %v405_v33 = vld [vmem:[#allocation5 + $0x4] sm:$0xf0]  ;;  %v66_v34 = vld [vmem:[%s610_s2] sm:$0x1] }
   0xf   :  { %185 = vmatpush.bf16.msra.mxu2 %v368_v21  ;;  %v404_v35 = vld [vmem:[#allocation5 + $0x4] sm:$0xf]  ;;  %v335_v36 = vld [vmem:[#allocation5 + $0x8] sm:$0xf0]  ;;  %67 = vst [vmem:[#allocation2] sm:$0x1] %v66_v34  ;;  %v334_v37 = vor.u32 %v405_v33, %v333_v32 }
  0x10   :  { %198 = vmatpush.bf16.msra.mxu3 %v372_v25  ;;  %v338_v38 = vor.u32 %v404_v35, %v335_v36  ;;  %v204_v42 = vld [vmem:[%s613_s5] sm:$0x3]  ;;  %v213_v43 = vand.u32 127, %v212_v41  ;;  %s482_s5 = smov 64   ;;  %v415_v6 = vld [vmem:[%s614_s6 + $0x18] sm:$0xff]  ;;  %v414_v7 = vld [vmem:[%s614_s6 + $0x10] sm:$0xff] }
  0x11   :  { %v206_v46 = vperm.slane %v204_v42, 0  ;;  %v207_v47 = vperm.slane %v204_v42, 1  ;;  %v413_v8 = vld [vmem:[%s614_s6 + $0x8] sm:$0xff]  ;;  %v412_v9 = vld [vmem:[%s614_s6] sm:$0xff]  ;;  %vm246_vm3 = vcmask 516096   ;;  %vm248_vm4 = vcmask 1040896  }
  0x12   :  { %381 = vmatmul.msk.bf16.vlgmr.msra.gmra.mxu2 %vm174_vm0, %v69_v29  ;;  %134 = vmatpush.bf16.msra.mxu0 %v342_v30  ;;  %v214_v50 = vadd.s32 128, %v213_v43  ;;  %v259_v18 = vld [vmem:[%s615_s7] sm:$0x1]  ;;  %s483_s29 = smov [#allocation8]   ;;  %s314_s12 = sshll.u32 %s616_s8, 4  ;;  %vm303_vm5 = vcmask 253952   ;;  %s315_s12 = int_to_ptr.hbm [resolvable:$true] %s314_s12 }
  0x13   :  { %382 = vmatmul.msk.bf16.vlgmr.msra.gmra.mxu3 %vm174_vm0, %v69_v29  ;;  %147 = vmatpush.bf16.msra.mxu1 %v346_v31  ;;  %s312_s30 = sshll.u32 %s483_s29, 4  ;;  %s313_s30 = int_to_ptr.vmem [resolvable:$true] %s312_s30 }
  0x14   :  { %vm218_vm2 = vcmp.lt.s32.totalorder %v214_v50, 192  ;;  %294 = vmatpush.bf16.msrb.mxu2 %v415_v6 }
  0x16   :  { %135 = vmatpush.bf16.msra.mxu0 %v334_v37  ;;  %v70_v39 = vld [vmem:[#allocation2] sm:$0x1] }
  0x17   :  { %148 = vmatpush.bf16.msra.mxu1 %v338_v38  ;;  %v75_v40 = vpack.c.bf16 %v70_v39, %v70_v39 }
  0x18   :  { %295 = vmatpush.bf16.msrb.mxu2 %v414_v7 }
  0x19   :  { %363 = vmatmul.msk.bf16.vlgmr.msra.gmra.mxu0 %vm124_vm1, %v75_v40 }
  0x1a   :  { %364 = vmatmul.msk.bf16.vlgmr.msra.gmra.mxu1 %vm124_vm1, %v75_v40 }
  0x1c   :  { %296 = vmatpush.bf16.msrb.mxu2 %v413_v8 }
  0x20   :  { %297 = vmatpush.bf16.msrb.mxu2 %v412_v9 }
  0x95   :  { %v187_v44 = vpop.f32.mrf.mxu2 }
  0x96   :  { %v200_v45 = vpop.f32.mrf.mxu3  ;;  %v137_v48 = vpop.f32.mrf.mxu0 }
  0x97   :  { %v150_v49 = vpop.f32.mrf.mxu1  ;;  %v188_v51 = vadd.f32 %v187_v44, %v137_v48 }
  0x98   :  { %v201_v52 = vadd.f32 %v200_v45, %v150_v49 }
  0x99   :  { %v210_v53 = vadd.f32 %v206_v46, %v188_v51 }
  0x9a   :  { %v211_v54 = vadd.f32 %v207_v47, %v201_v52 }
  0x9b   :  { %v221_v55 = vmul.f32 0.5, %v210_v53 }
  0x9c   :  { %v222_v56 = vmul.f32 0.5, %v211_v54 }
  0x9d   :  { %v189_v57 = vpop.f32.mrf.mxu2  ;;  %421 = vtanh.f32 %v221_v55 }
  0x9e   :  { %v202_v58 = vpop.f32.mrf.mxu3  ;;  %v224_v59 = vsel %vm218_vm2, %v211_v54, %v222_v56  ;;  %v139_v60 = vpop.f32.mrf.mxu0 }
  0x9f   :  { %v152_v61 = vpop.f32.mrf.mxu1  ;;  %423 = vtanh.f32 %v224_v59 }
  0xa3   :  { %v422_v62 = vpop.eup %421 }
  0xa4   :  { %v227_v0 = vmul.f32 0.5, %v422_v62 }
  0xa5   :  { %v424_v63 = vpop.eup %423 }
  0xa6   :  { %v228_v1 = vmul.f32 0.5, %v424_v63  ;;  %v229_v2 = vadd.f32 0.5, %v227_v0 }
  0xa8   :  { %v230_v3 = vadd.f32 0.5, %v228_v1  ;;  %v233_v10 = vmul.f32 %v229_v2, %v70_v39 }
  0xaa   :  { %v232_v4 = vsel %vm218_vm2, %v424_v63, %v230_v3 }
  0xab   :  { %v234_v5 = vmul.f32 %v232_v4, %v229_v2 }
  0xad   :  { %236 = vrot.lane.b32.xlu0 %v234_v5, %s482_s5 }
 0x11f   :  { %v237_v11 = vpop.permute.xlu0 %236 }
 0x120   :  { %v239_v12 = vadd.f32 %v237_v11, %v233_v10 }
 0x122   :  { %425 = vtanh.f32 %v239_v12 }
 0x128   :  { %v426_v13 = vpop.eup %425 }
 0x129   :  { %v241_v14 = vmul.f32 %v426_v13, %v232_v4 }
 0x12b   :  { %243 = vrot.lane.b32.xlu1 %v241_v14, %s482_s5  ;;  %v250_v15 = vpack.c.bf16 %v241_v14, %v241_v14 }
 0x12d   :  { %261 = vrot.lane.b32.xlu0 %v250_v15, %s482_s5 }
 0x19d   :  { %v244_v16 = vpop.permute.xlu1 %243 }
 0x19e   :  { %247 = vst.msk [vmem:[#allocation2] sm:$0x1] %vm246_vm3, %v244_v16 }
 0x19f   :  { %249 = vst.msk [vmem:[#allocation2] sm:$0x1] %vm248_vm4, %v239_v12  ;;  %v262_v17 = vpop.permute.xlu0 %261 }
 0x1a0   :  { %305 = vst.msk [vmem:[%s617_s9] sm:$0x1] %vm246_vm3, %v244_v16  ;;  %399 = vmatmul.msk.bf16.vlgmr.msrb.gmra.mxu2 %vm124_vm1, %v262_v17 }
 0x1a1   :  { %306 = vst.msk [vmem:[%s617_s9] sm:$0x1] %vm248_vm4, %v239_v12 }
 0x223   :  { %v299_v19 = vpop.f32.mrf.mxu2 }
 0x224   :  { %v300_v20 = vadd.f32 %v299_v19, %v259_v18 }
 0x226   :  { %304 = vst.msk [vmem:[#allocation8] sm:$0x1] %vm303_vm5, %v300_v20 }
 0x227   :  { %317 = dma.vmem_to_hbm [thread:$0]  %s313_s30, 16, %s315_s12, [#allocation7]  }
 0x22b   :  { %v301_v21 = vpop.f32.mrf.mxu2 }
 0x22c   :  { %477 = dma.done.wait [#allocation7], 16  }
 0x22d   :  { %478 = vsyncadd [#allocation7], 4294967280 }
 0x22e   :  { %326 = vsyncpa [#allocation6], 1 }
 0x22f   :  { %327 = vsyncpa [#allocation7], 1 }

</bundles_post_ra>
